<compile_context>
chip_gen: v7x
topology: tpu7x:2x2x1
jax: 0.10.0
libtpu: 0.0.40
codegen_flags: <defaults>
</compile_context>

<pallas_src>
import functools
import math

import jax
import jax.numpy as jnp
from jax.experimental import pallas as pl
from jax.experimental.pallas import tpu as pltpu

LANES = 128  # lane width of the flattened view (last dim of every block)


def _kd_kernel(*refs, n_t, inv_T, inv_Tn, slab, trips, rows_valid, tile_rows,
               needs_mask):
    """One grid step: (tile_rows, 128) student + teacher tiles -> (slab, 128)
    float32 partial sum of the pointwise KL terms, streamed slab by slab."""
    y_s_ref = refs[0]
    y_t_refs = refs[1:1 + n_t]
    out_ref = refs[1 + n_t]

    lanes = out_ref.shape[-1]
    base_row = pl.program_id(0) * tile_rows

    def slab_term(row_off):
        p_s = y_s_ref[pl.ds(row_off, slab), :].astype(jnp.float32) * inv_T
        # Sum the teacher ensemble directly from the separate inputs (no stacked
        # copy), folding the 1/(T * n_t) scale into one precomputed multiply.
        t_sum = y_t_refs[0][pl.ds(row_off, slab), :].astype(jnp.float32)
        for r in y_t_refs[1:]:
            t_sum = t_sum + r[pl.ds(row_off, slab), :].astype(jnp.float32)
        p_t = t_sum * inv_Tn
        # F.kl_div pointwise term: xlogy(p_t, p_t) - p_t*p_s.
        # Safe log: never evaluate log(0); select reproduces xlogy(0,0) == 0.
        log_t = jnp.log(jnp.where(p_t == 0.0, 1.0, p_t))
        term = jnp.where(p_t == 0.0, 0.0, p_t * (log_t - p_s))
        if needs_mask:
            # Ragged-tail handling: rows past the true row count were never DMA'd
            # (undefined VMEM contents) -> zero them via an explicit index mask.
            rows = (base_row + row_off
                    + jax.lax.broadcasted_iota(jnp.int32, (slab, lanes), 0))
            term = jnp.where(rows < rows_valid, term, 0.0)
        return term

    if trips == 1:
        out_ref[...] = slab_term(0)
    else:
        def body(it, acc):
            row_off = pl.multiple_of(it * slab, slab)
            return acc + slab_term(row_off)

        out_ref[...] = jax.lax.fori_loop(
            0, trips, body, jnp.zeros((slab, lanes), jnp.float32))


def _round_down8(x):
    return (x // 8) * 8


def kd_ensemble_one(y_s, y_t_list, T, *, tile_rows=None,
                    step_bytes_target=8 << 20, vmem_input_budget=16 << 20):
    """Pallas implementation of KDEnsembleOne.forward(y_s, y_t_list)."""
    n_t = len(y_t_list)
    assert n_t > 0  # TODO(synk): torch code NameErrors on empty y_t; not modeled.
    B, C = y_s.shape
    assert B > 0

    itemsize = max(jnp.dtype(y_s.dtype).itemsize,
                   max(jnp.dtype(t.dtype).itemsize for t in y_t_list))

    # ---- Lane-dense flatten: (B, C) -> (R, 128), independent of C. ----
    N = B * C
    flats = [y_s.reshape(-1)] + [t.reshape(-1) for t in y_t_list]
    rem = (-N) % LANES
    if rem:
        # Rare (only when B*C is not lane-aligned): tail-only zero pad; zero
        # elements give p_t == 0 -> exactly 0 contribution to the KL sum.
        flats = [jnp.pad(f, (0, rem)) for f in flats]
    R = (N + rem) // LANES
    arrs = [f.reshape(R, LANES) for f in flats]

    # ---- Row-tile sizing (bytes-targeted, VMEM-bounded, >= 2 steps/TC). ----
    bytes_per_row = (n_t + 1) * LANES * itemsize
    if R < 8:
        tr = R  # tiny input: one full-extent block (allowed: equals full dim)
    else:
        r8 = _round_down8(R)  # largest 8-aligned tile that never exceeds R
        if tile_rows is not None:
            tr = max(8, min(_round_down8(tile_rows), r8))
        else:
            # ~step_bytes_target of input DMA per grid step; double-buffered
            # footprint stays well under v7x's 64 MiB/TC VMEM.
            tr = min(step_bytes_target, vmem_input_budget // 2) // bytes_per_row
            tr = max(8, min(_round_down8(tr), r8))
            if R >= 32:
                # >= 4 grid steps: 2 per TensorCore on v7x, and a steady-state
                # DMA pipeline on single-TC v5e/v6e.
                tr = min(tr, max(8, _round_down8(-(-R // 4))))
            steps = -(-R // tr)
            if steps > 1 and steps % 2:
                # Prefer an even step count so both v7x cores split evenly.
                cand = max(8, _round_down8(-(-R // (steps + 1))))
                if (-(-R // cand)) % 2 == 0:
                    tr = cand

    slab = math.gcd(tr, 64) if tr >= 8 else tr   # aligned streaming slab
    trips = tr // slab
    num_tiles = -(-R // tr)
    needs_mask = (R % tr) != 0

    kernel = functools.partial(
        _kd_kernel,
        n_t=n_t,
        inv_T=1.0 / float(T),
        inv_Tn=1.0 / (float(T) * n_t),
        slab=slab,
        trips=trips,
        rows_valid=R,
        tile_rows=tr,
        needs_mask=needs_mask,
    )

    # Double-buffered inputs + tiny output + headroom; capped to respect v7x's
    # 64 MiB/TC physical VMEM (auto-sizing keeps us far below the cap anyway).
    in_db = 2 * (n_t + 1) * tr * LANES * itemsize
    out_db = 2 * slab * LANES * 4
    vmem_limit = max(32 << 20, min(in_db + out_db + (8 << 20), 60 << 20))

    row_spec = pl.BlockSpec((tr, LANES), lambda i: (i, 0))
    partials = pl.pallas_call(
        kernel,
        out_shape=jax.ShapeDtypeStruct((num_tiles, slab, LANES), jnp.float32),
        grid_spec=pltpu.PrefetchScalarGridSpec(
            num_scalar_prefetch=0,
            grid=(num_tiles,),
            in_specs=[row_spec] * (1 + n_t),   # student + each teacher, no stack
            out_specs=pl.BlockSpec((None, slab, LANES), lambda i: (i, 0, 0)),
        ),
        compiler_params=pltpu.CompilerParams(
            # Tiles are fully independent -> both TensorCores participate on v7x.
            dimension_semantics=("parallel",),
            vmem_limit_bytes=int(vmem_limit),
        ),
    )(*arrs)

    # Single final cross-lane reduce + T^2 / batch scale in the wrapper.
    return jnp.sum(partials, dtype=jnp.float32) * jnp.float32(float(T) ** 2) / B


def kd_ensemble_one_ref(y_s, y_t_list, T):
    """Pure-JAX reference mirroring the PyTorch forward."""
    p_s = y_s / T
    p_t = sum(y_t_list) / T / len(y_t_list)
    kl = jnp.sum(jnp.where(p_t == 0.0, 0.0, p_t * jnp.log(p_t)) - p_t * p_s)
    return kl * (T ** 2) / y_s.shape[0]


if __name__ == "__main__":
    T = 4.0
    key = jax.random.PRNGKey(0)
    k1, k2, k3 = jax.random.split(key, 3)

    def make_inputs(B, C, Nt, k):
        ks, *kts = jax.random.split(k, 1 + Nt)
        y_s = jax.random.normal(ks, (B, C), dtype=jnp.float32)
        # Probability-like teacher outputs so log(target) is finite (intended
        # F.kl_div usage); semantics are identical for any inputs.
        y_t_list = [
            jax.nn.softmax(jax.random.normal(kk, (B, C), dtype=jnp.float32), axis=-1)
            for kk in kts
        ]
        return y_s, y_t_list

    # Case 1: lane-aligned shape, auto tile sizing (single step, no masking).
    y_s, y_t = make_inputs(16, 128, 3, k1)
    loss = jax.block_until_ready(kd_ensemble_one(y_s, y_t, T))
    ref = kd_ensemble_one_ref(y_s, y_t, T)
    assert jnp.allclose(loss, ref, rtol=1e-5, atol=1e-5), (loss, ref)

    # Case 2: multiple grid steps + ragged-row tail masked in-kernel (R=18, tr=8).
    y_s2, y_t2 = make_inputs(24, 96, 2, k2)
    loss2 = jax.block_until_ready(kd_ensemble_one(y_s2, y_t2, T, tile_rows=8))
    ref2 = kd_ensemble_one_ref(y_s2, y_t2, T)
    assert jnp.allclose(loss2, ref2, rtol=1e-5, atol=1e-5), (loss2, ref2)

    # Case 3: non-lane-aligned B*C (flat tail pad), ragged rows, and the
    # multi-slab fori_loop streaming path (tr=24 -> slab=8, trips=3).
    y_s3, y_t3 = make_inputs(33, 100, 2, k3)
    loss3 = jax.block_until_ready(kd_ensemble_one(y_s3, y_t3, T, tile_rows=24))
    ref3 = kd_ensemble_one_ref(y_s3, y_t3, T)
    assert jnp.allclose(loss3, ref3, rtol=1e-5, atol=1e-5), (loss3, ref3)

    print("KERNEL_OK")
</pallas_src>

<mosaic_0001>
module attributes {stable_mosaic.version = 11 : i64} {
  func.func @_kd_kernel(%arg0: i32, %arg1: memref<16x128xf32, #tpu.memory_space<vmem>>, %arg2: memref<16x128xf32, #tpu.memory_space<vmem>>, %arg3: memref<16x128xf32, #tpu.memory_space<vmem>>, %arg4: memref<16x128xf32, #tpu.memory_space<vmem>>, %arg5: memref<1x16x128xf32, #tpu.memory_space<vmem>>) attributes {dimension_semantics = [#tpu.dimension_semantics<parallel>], iteration_bounds = array<i64: 1>, scalar_prefetch = 0 : i64, scratch_operands = 0 : i64, tpu.core_type = #tpu.core_type<tc>, window_params = [{transform_indices = @transform_0, window_bounds = array<i64: 16, 128>}, {transform_indices = @transform_1, window_bounds = array<i64: 16, 128>}, {transform_indices = @transform_2, window_bounds = array<i64: 16, 128>}, {transform_indices = @transform_3, window_bounds = array<i64: 16, 128>}, {transform_indices = @transform_4, window_bounds = array<i64: 1, 16, 128>}]} {
    %c0 = arith.constant 0 : index
    %c0_0 = arith.constant 0 : index
    %0 = vector.load %arg1[%c0, %c0_0] : memref<16x128xf32, #tpu.memory_space<vmem>>, vector<16x128xf32>
    %cst = arith.constant 2.500000e-01 : f32
    %1 = vector.broadcast %cst : f32 to vector<16x128xf32>
    %2 = arith.mulf %0, %1 : vector<16x128xf32>
    %c0_1 = arith.constant 0 : index
    %c0_2 = arith.constant 0 : index
    %3 = vector.load %arg2[%c0_1, %c0_2] : memref<16x128xf32, #tpu.memory_space<vmem>>, vector<16x128xf32>
    %c0_3 = arith.constant 0 : index
    %c0_4 = arith.constant 0 : index
    %4 = vector.load %arg3[%c0_3, %c0_4] : memref<16x128xf32, #tpu.memory_space<vmem>>, vector<16x128xf32>
    %5 = arith.addf %3, %4 : vector<16x128xf32>
    %c0_5 = arith.constant 0 : index
    %c0_6 = arith.constant 0 : index
    %6 = vector.load %arg4[%c0_5, %c0_6] : memref<16x128xf32, #tpu.memory_space<vmem>>, vector<16x128xf32>
    %7 = arith.addf %5, %6 : vector<16x128xf32>
    %cst_7 = arith.constant 0.0833333358 : f32
    %8 = vector.broadcast %cst_7 : f32 to vector<16x128xf32>
    %9 = arith.mulf %7, %8 : vector<16x128xf32>
    %cst_8 = arith.constant 0.000000e+00 : f32
    %10 = vector.broadcast %cst_8 : f32 to vector<16x128xf32>
    %11 = arith.cmpf oeq, %9, %10 : vector<16x128xf32>
    %cst_9 = arith.constant 1.000000e+00 : f32
    %12 = vector.broadcast %cst_9 : f32 to vector<16x128xf32>
    %13 = arith.select %11, %12, %9 : vector<16x128xi1>, vector<16x128xf32>
    %14 = math.log %13 : vector<16x128xf32>
    %cst_10 = arith.constant 0.000000e+00 : f32
    %15 = vector.broadcast %cst_10 : f32 to vector<16x128xf32>
    %16 = arith.cmpf oeq, %9, %15 : vector<16x128xf32>
    %17 = arith.subf %14, %2 : vector<16x128xf32>
    %18 = arith.mulf %9, %17 : vector<16x128xf32>
    %cst_11 = arith.constant 0.000000e+00 : f32
    %19 = vector.broadcast %cst_11 : f32 to vector<16x128xf32>
    %20 = arith.select %16, %19, %18 : vector<16x128xi1>, vector<16x128xf32>
    %c0_12 = arith.constant 0 : index
    %c0_13 = arith.constant 0 : index
    %c0_14 = arith.constant 0 : index
    %21 = vector.load %arg5[%c0_12, %c0_13, %c0_14] : memref<1x16x128xf32, #tpu.memory_space<vmem>>, vector<1x16x128xf32>
    %22 = vector.shape_cast %21 : vector<1x16x128xf32> to vector<16x128xf32>
    %23 = vector.shape_cast %20 : vector<16x128xf32> to vector<1x16x128xf32>
    tpu.vector_store %arg5[%c0_12, %c0_13, %c0_14], %23 {strides = array<i32>} : memref<1x16x128xf32, #tpu.memory_space<vmem>>, vector<1x16x128xf32>,
    return
  }
  func.func @transform_0(%arg0: i32) -> (i32, i32) {
    %c0_i32 = arith.constant 0 : i32
    %c0_i32_0 = arith.constant 0 : i32
    return %arg0, %c0_i32 : i32, i32
  }
  func.func @transform_1(%arg0: i32) -> (i32, i32) {
    %c0_i32 = arith.constant 0 : i32
    %c0_i32_0 = arith.constant 0 : i32
    return %arg0, %c0_i32 : i32, i32
  }
  func.func @transform_2(%arg0: i32) -> (i32, i32) {
    %c0_i32 = arith.constant 0 : i32
    %c0_i32_0 = arith.constant 0 : i32
    return %arg0, %c0_i32 : i32, i32
  }
  func.func @transform_3(%arg0: i32) -> (i32, i32) {
    %c0_i32 = arith.constant 0 : i32
    %c0_i32_0 = arith.constant 0 : i32
    return %arg0, %c0_i32 : i32, i32
  }
  func.func @transform_4(%arg0: i32) -> (i32, i32, i32) {
    %c0_i32 = arith.constant 0 : i32
    %c0_i32_0 = arith.constant 0 : i32
    %c0_i32_1 = arith.constant 0 : i32
    return %arg0, %c0_i32, %c0_i32_0 : i32, i32, i32
  }
}

</mosaic_0001>

<bundles_post_ra>
// kernel: tpu_custom_call.1
= control target key start
LH: loop header
LB: loop body
LE: loop exit
PB: predicated region body
PF: predicated region fallthrough
CT: control target
= control target key end

     0   :  { %9 = vsyncpa [#allocation3], 0  ;;  %s378_s0 = inlined_call_operand.hbm [shape: f32[16,128], index: 0, kind: input, shape index: {}]   ;;  %s379_s1 = inlined_call_operand.hbm [shape: f32[16,128], index: 1, kind: input, shape index: {}]   ;;  %s380_s2 = inlined_call_operand.hbm [shape: f32[16,128], index: 2, kind: input, shape index: {}]   ;;  %s381_s3 = inlined_call_operand.hbm [shape: f32[16,128], index: 3, kind: input, shape index: {}]   ;;  %s382_s4 = inlined_call_operand.hbm [shape: f32[1,16,128], index: 4, kind: output, shape index: {}]  }
   0x1   :  { %10 = vsyncpa [#allocation6], 0 }
   0x2   :  { %11 = vsyncpa [#allocation9], 0 }
   0x3   :  { %12 = vsyncpa [#allocation4], 0  ;;  %s253_s15 = smov [#allocation5]   ;;  %s254_s17 = smov [#allocation2]  }
   0x4   :  { %s30_s16 = sshll.u32 %s253_s15, 4  ;;  %s18_s18 = sshll.u32 %s254_s17, 4  ;;  %s31_s16 = int_to_ptr.vmem [resolvable:$true] %s30_s16  ;;  %s285_s18 = int_to_ptr.vmem [resolvable:$true] %s18_s18 }
   0x5   :  { %s135_s21 = scalar_lea.hbm %s379_s1, 256 }
   0x6   :  { %p136_p0 = scmp.ne.s32.totalorder %s379_s1, %s135_s21  ;;  %p139_p1 = scmp.lt.u32.totalorder %s135_s21, %s379_s1 }
   0x8   :  { %p141_p2 = pnand %p139_p1, %p136_p0 }
   0xa   :  { %144 = shalt.err (!%p141_p2)
}
   0xb   :  { %s145_s26 = scalar_lea.vmem %s31_s16, 256  ;;  %p150_p4 = scmp.lt.s32.totalorder %s31_s16, %s31_s16 }
   0xc   :  { %p146_p3 = scmp.ne.s32.totalorder %s31_s16, %s145_s26  ;;  %p151_p5 = scmp.lt.s32.totalorder %s145_s26, %s145_s26 }
   0xe   :  { %p152_p6 = por %p151_p5, %p150_p4 }
  0x10   :  { %p153_p7 = pnand %p152_p6, %p146_p3 }
  0x12   :  { %156 = shalt.err (!%p153_p7)
}
  0x13   :  { %s255_s27 = smov 128   ;;  %s256_s28 = smov 8  }
  0x14   :  { %36 = dma.hbm_to_vmem [thread:$0]  %s379_s1, 256, %s31_s16, [#allocation6], %s255_s27, %s255_s27, %s256_s28  }
  0x15   :  { %s157_s7 = scalar_lea.hbm %s378_s0, 256 }
  0x16   :  { %p158_p8 = scmp.ne.s32.totalorder %s378_s0, %s157_s7  ;;  %p161_p9 = scmp.lt.u32.totalorder %s157_s7, %s378_s0 }
  0x18   :  { %p163_p10 = pnand %p161_p9, %p158_p8 }
  0x1a   :  { %166 = shalt.err (!%p163_p10)
}
  0x1b   :  { %s167_s12 = scalar_lea.vmem %s285_s18, 256  ;;  %p172_p12 = scmp.lt.s32.totalorder %s285_s18, %s285_s18 }
  0x1c   :  { %p168_p11 = scmp.ne.s32.totalorder %s285_s18, %s167_s12  ;;  %p173_p13 = scmp.lt.s32.totalorder %s167_s12, %s167_s12 }
  0x1e   :  { %p174_p0 = por %p173_p13, %p172_p12 }
  0x20   :  { %p175_p1 = pnand %p174_p0, %p168_p11 }
  0x22   :  { %178 = shalt.err (!%p175_p1)
}
  0x23   :  { %24 = dma.hbm_to_vmem [thread:$0]  %s378_s0, 256, %s285_s18, [#allocation3], %s255_s27, %s255_s27, %s256_s28  }
  0x24   :  { %s257_s14 = smov [#allocation7]   ;;  %s258_s16 = smov [#allocation8]  }
  0x25   :  { %s42_s15 = sshll.u32 %s257_s14, 4  ;;  %s54_s17 = sshll.u32 %s258_s16, 4  ;;  %s43_s15 = int_to_ptr.vmem [resolvable:$true] %s42_s15  ;;  %s322_s17 = int_to_ptr.vmem [resolvable:$true] %s54_s17 }
  0x26   :  { %s179_s21 = scalar_lea.hbm %s380_s2, 256 }
  0x27   :  { %p180_p2 = scmp.ne.s32.totalorder %s380_s2, %s179_s21  ;;  %p183_p3 = scmp.lt.u32.totalorder %s179_s21, %s380_s2 }
  0x29   :  { %p185_p4 = pnand %p183_p3, %p180_p2 }
  0x2b   :  { %188 = shalt.err (!%p185_p4)
}
  0x2c   :  { %s189_s0 = scalar_lea.vmem %s43_s15, 256  ;;  %p194_p6 = scmp.lt.s32.totalorder %s43_s15, %s43_s15 }
  0x2d   :  { %p190_p5 = scmp.ne.s32.totalorder %s43_s15, %s189_s0  ;;  %p195_p7 = scmp.lt.s32.totalorder %s189_s0, %s189_s0 }
  0x2f   :  { %p196_p8 = por %p195_p7, %p194_p6 }
  0x31   :  { %p197_p9 = pnand %p196_p8, %p190_p5 }
  0x33   :  { %200 = shalt.err (!%p197_p9)
}
  0x34   :  { %48 = dma.hbm_to_vmem [thread:$0]  %s380_s2, 256, %s43_s15, [#allocation6], %s255_s27, %s255_s27, %s256_s28  }
  0x35   :  { %s201_s5 = scalar_lea.hbm %s381_s3, 256 }
  0x36   :  { %p202_p10 = scmp.ne.s32.totalorder %s381_s3, %s201_s5  ;;  %p205_p11 = scmp.lt.u32.totalorder %s201_s5, %s381_s3 }
  0x38   :  { %p207_p12 = pnand %p205_p11, %p202_p10 }
  0x3a   :  { %210 = shalt.err (!%p207_p12)
}
  0x3b   :  { %s211_s10 = scalar_lea.vmem %s322_s17, 256  ;;  %p216_p0 = scmp.lt.s32.totalorder %s322_s17, %s322_s17 }
  0x3c   :  { %p212_p13 = scmp.ne.s32.totalorder %s322_s17, %s211_s10  ;;  %p217_p1 = scmp.lt.s32.totalorder %s211_s10, %s211_s10 }
  0x3e   :  { %p218_p2 = por %p217_p1, %p216_p0 }
  0x40   :  { %p219_p3 = pnand %p218_p2, %p212_p13 }
  0x42   :  { %222 = shalt.err (!%p219_p3)
}
  0x43   :  { %60 = dma.hbm_to_vmem [thread:$0]  %s381_s3, 256, %s322_s17, [#allocation9], %s255_s27, %s255_s27, %s256_s28  }
  0x44   :  { %245 = dma.done.wait [#allocation3], 256  }
  0x45   :  { %246 = vsyncadd [#allocation3], 4294967040 }
  0x46   :  { %247 = dma.done.wait [#allocation6], 512  }
  0x47   :  { %248 = vsyncadd [#allocation6], 4294966784 }
  0x48   :  { %249 = dma.done.wait [#allocation9], 256  }
  0x49   :  { %250 = vsyncadd [#allocation9], 4294967040  ;;  %v77_v0 = vld [vmem:[#allocation5] sm:$0xff]  ;;  %v79_v1 = vld [vmem:[#allocation7] sm:$0xff]  ;;  %s259_s3 = smov [#allocation10]  }
  0x4a   :  { %v81_v2 = vadd.f32 %v79_v1, %v77_v0  ;;  %v83_v3 = vld [vmem:[#allocation8] sm:$0xff]  ;;  %v78_v4 = vld [vmem:[#allocation5 + $0x8] sm:$0xff]  ;;  %v80_v5 = vld [vmem:[#allocation7 + $0x8] sm:$0xff]  ;;  %s110_s12 = sshll.u32 %s259_s3, 4  ;;  %s111_s12 = int_to_ptr.vmem [resolvable:$true] %s110_s12 }
  0x4b   :  { %v84_v6 = vld [vmem:[#allocation8 + $0x8] sm:$0xff]  ;;  %v82_v8 = vadd.f32 %v80_v5, %v78_v4  ;;  %v73_v14 = vld [vmem:[#allocation2] sm:$0xff]  ;;  %v74_v15 = vld [vmem:[#allocation2 + $0x8] sm:$0xff]  ;;  %s223_s1 = scalar_lea.vmem %s111_s12, 256  ;;  %p228_p5 = scmp.lt.s32.totalorder %s111_s12, %s111_s12 }
  0x4c   :  { %v85_v7 = vadd.f32 %v83_v3, %v81_v2  ;;  %v75_v16 = vmul.f32 0.25, %v73_v14  ;;  %v76_v19 = vmul.f32 0.25, %v74_v15  ;;  %p224_p4 = scmp.ne.s32.totalorder %s111_s12, %s223_s1  ;;  %p229_p6 = scmp.lt.s32.totalorder %s223_s1, %s223_s1 }
  0x4d   :  { %v86_v10 = vadd.f32 %v84_v6, %v82_v8 }
  0x4e   :  { %v87_v9 = vmul.f32 0.083333336, %v85_v7  ;;  %p230_p7 = por %p229_p6, %p228_p5 }
  0x4f   :  { %v88_v11 = vmul.f32 0.083333336, %v86_v10 }
  0x50   :  { %vm89_vm0 = vcmp.eq.f32.partialorder %v87_v9, 0.0  ;;  %p231_p8 = pnand %p230_p7, %p224_p4 }
  0x51   :  { %v91_v12 = vsel %vm89_vm0, 1.0, %v87_v9  ;;  %vm90_vm1 = vcmp.eq.f32.partialorder %v88_v11, 0.0 }
  0x52   :  { %131 = vlog2.f32 %v91_v12  ;;  %v92_v13 = vsel %vm90_vm1, 1.0, %v88_v11 }
  0x53   :  { %133 = vlog2.f32 %v92_v13 }
  0x5c   :  { %v132_v17 = vpop.eup %131 }
  0x5d   :  { %v94_v18 = vmul.f32 0.6931472, %v132_v17  ;;  %v134_v20 = vpop.eup %133 }
  0x5e   :  { %v96_v22 = vmul.f32 0.6931472, %v134_v20 }
  0x5f   :  { %v97_v21 = vsub.f32 %v94_v18, %v75_v16 }
  0x60   :  { %v98_v24 = vsub.f32 %v96_v22, %v76_v19 }
  0x61   :  { %v99_v23 = vmul.f32 %v97_v21, %v87_v9 }
  0x62   :  { %v100_v26 = vmul.f32 %v98_v24, %v88_v11 }
  0x63   :  { %v101_v25 = vsel %vm89_vm0, 0.0, %v99_v23 }
  0x64   :  { %103 = vst [vmem:[#allocation10] sm:$0xff] %v101_v25  ;;  %v102_v27 = vsel %vm90_vm1, 0.0, %v100_v26 }
  0x65   :  { %104 = vst [vmem:[#allocation10 + $0x8] sm:$0xff] %v102_v27 }
  0x66   :  { %234 = shalt.err (!%p231_p8)
}
  0x67   :  { %s235_s15 = scalar_lea.hbm %s382_s4, 256 }
  0x68   :  { %p236_p9 = scmp.ne.s32.totalorder %s382_s4, %s235_s15  ;;  %p239_p10 = scmp.lt.u32.totalorder %s235_s15, %s382_s4 }
  0x6a   :  { %p241_p11 = pnand %p239_p10, %p236_p9 }
  0x6c   :  { %244 = shalt.err (!%p241_p11)
}
  0x6d   :  { %116 = dma.vmem_to_hbm [thread:$0]  %s111_s12, 256, %s382_s4, [#allocation4], %s255_s27, %s255_s27, %s256_s28  }
  0x6e   :  { %251 = dma.done.wait [#allocation4], 256  }
  0x6f   :  { %252 = vsyncadd [#allocation4], 4294967040 }
  0x70   :  { %120 = vsyncpa [#allocation3], 1 }
  0x71   :  { %121 = vsyncpa [#allocation6], 1 }
  0x72   :  { %122 = vsyncpa [#allocation9], 1 }
  0x73   :  { %123 = vsyncpa [#allocation4], 1 }

</bundles_post_ra>
